<compile_context>
chip_gen: v7x
topology: tpu7x:2x2x1
jax: 0.10.0
libtpu: 0.0.40
codegen_flags: <defaults>
</compile_context>

<pallas_src>
import jax
import jax.numpy as jnp
from jax.experimental import pallas as pl
from jax.experimental.pallas import tpu as pltpu


def _round_up(v, q):
    return -(-v // q) * q


def _sublane(itemsize):
    # Sublane padding of the second-to-last block dim: 8 (f32) / 16 (bf16) / 32 (i8).
    return max(8, 32 // max(itemsize, 1))


def _vmem_budget_bytes():
    """Return (resident single-buffer block budget, physical VMEM capacity)."""
    try:
        cap = int(pltpu.get_tpu_info().vmem_capacity_bytes)
    except Exception:
        cap = 64 * 1024 * 1024          # conservative fallback: v7x per-TC VMEM
    # Resident blocks at ~1/8 of capacity: double buffering doubles the real
    # footprint and the compiler needs scratch/headroom on top.
    return max(4 * 1024 * 1024, cap // 8), cap


def _pick_tile_m(n, m, c_in, c_out, dtype, budget):
    """Lane-dense tile along M (multiple of 128 unless M itself is smaller)."""
    itemsize = jnp.dtype(dtype).itemsize
    sub = _sublane(itemsize)

    if m <= 128:
        return m                          # one (full-extent) block along M

    # Honest VMEM accounting: sublane-padded x + out columns (double-buffered)
    # plus the lane/sublane-padded weight block.
    per_col = (_round_up(c_in, sub) + _round_up(c_out, sub)) * itemsize
    w_bytes = _round_up(c_out, sub) * _round_up(c_in, 128) * itemsize
    avail = max(budget - 2 * w_bytes, 2 * 128 * per_col)
    cap_tile = (avail // (2 * per_col)) // 128 * 128        # 2x: double buffering
    cap_tile = int(min(max(cap_tile, 128), 65536))

    # Never let the grid collapse: aim for >= ~8 total work items so both v7x
    # TensorCores get work and the DMA pipeline has steps to overlap.
    m_steps_wanted = max(2, -(-8 // max(n, 1)))
    tile_for_steps = max(128, (m // m_steps_wanted) // 128 * 128)

    # No divisor search: accept a ragged last block rather than shrinking the
    # tile (128-lane tiles run at ~1/3 of the HBM roofline).
    return int(min(cap_tile, tile_for_steps, _round_up(m, 128)))


def _outconv_kernel(x_ref, w_ref, b_ref, o_ref):
    # x_ref: (C_in, TM)  w_ref: (C_out, C_in)  b_ref: (C_out, 1)  o_ref: (C_out, TM)
    c_out, c_in = w_ref.shape
    tm = x_ref.shape[1]

    if c_in <= 16 and c_out <= 8:
        # VPU path for tiny channel counts: unrolled broadcast-FMAs, lane dense.
        # Kept in f32 (v5e's VPU has no bf16 math); slabs here are tiny so the
        # cast cost is negligible on v6e/v7x.
        x = x_ref[...].astype(jnp.float32)
        w = w_ref[...].astype(jnp.float32)
        b = b_ref[...].astype(jnp.float32)
        acc = jnp.broadcast_to(b, (c_out, tm))
        for c in range(c_in):             # static unroll (C_in is compile-time)
            acc = acc + w[:, c:c + 1] * x[c:c + 1, :]
        o_ref[...] = acc.astype(o_ref.dtype)
    else:
        # MXU path: feed the native dtype straight into the matmul (native bf16
        # MXU on v6e/v7x); accumulate in f32, add the bias in f32.
        acc = jnp.dot(w_ref[...], x_ref[...], preferred_element_type=jnp.float32)
        acc = acc + b_ref[...].astype(jnp.float32)
        o_ref[...] = acc.astype(o_ref.dtype)


def outconv_forward(x, weight, bias, *, tile_m=None):
    """x: (N, C_in, D, H, W); weight: (C_out, C_in, 1, 1, 1); bias: (C_out,)."""
    n, c_in, d, h, w = x.shape
    c_out = weight.shape[0]
    m = d * h * w

    # Channels-first flattening: no transpose, no pad, no extra HBM traffic.
    x3 = x.reshape(n, c_in, m)                         # (N, C_in, M)
    w2 = weight.reshape(c_out, c_in)                   # (C_out, C_in)
    b2 = bias.reshape(c_out, 1)                        # (C_out, 1)

    budget, vmem_cap = _vmem_budget_bytes()
    if tile_m is None:
        tile_m = _pick_tile_m(n, m, c_in, c_out, x.dtype, budget)

    grid = (n, pl.cdiv(m, tile_m))

    # Explicit scoped-VMEM limit: enough for the double-buffered blocks plus
    # headroom, never above half the physical per-core capacity.
    itemsize = jnp.dtype(x.dtype).itemsize
    sub = _sublane(itemsize)
    blk_bytes = (_round_up(c_in, sub) + _round_up(c_out, sub)) * itemsize \
        * _round_up(tile_m, 128)
    w_bytes = _round_up(c_out, sub) * (_round_up(c_in, 128) + 128) * itemsize
    need = 2 * blk_bytes + 2 * w_bytes + (4 << 20)
    vmem_limit = int(min(vmem_cap // 2, max(need, 32 << 20)))

    out3 = pl.pallas_call(
        _outconv_kernel,
        out_shape=jax.ShapeDtypeStruct((n, c_out, m), x.dtype),
        grid_spec=pltpu.PrefetchScalarGridSpec(
            num_scalar_prefetch=0,
            grid=grid,
            in_specs=[
                # Leading batch dim squeezed out of the kernel view.
                pl.BlockSpec((None, c_in, tile_m), lambda bi, mi: (bi, 0, mi)),
                pl.BlockSpec((c_out, c_in), lambda bi, mi: (0, 0)),
                pl.BlockSpec((c_out, 1), lambda bi, mi: (0, 0)),
            ],
            out_specs=pl.BlockSpec((None, c_out, tile_m),
                                   lambda bi, mi: (bi, 0, mi)),
        ),
        compiler_params=pltpu.CompilerParams(
            # Both axes parallel -> megacore sharding on v7x.
            dimension_semantics=("parallel", "parallel"),
            vmem_limit_bytes=vmem_limit),
    )(x3, w2, b2)

    return out3.reshape(n, c_out, d, h, w)


if __name__ == "__main__":
    # Small shapes consistent with the module: batch=2, in_ch=4, out_ch=3, D=H=W=8
    n, c_in, c_out, d, h, w = 2, 4, 3, 8, 8, 8

    key = jax.random.PRNGKey(0)
    kx, kw, kb = jax.random.split(key, 3)

    x = jax.random.normal(kx, (n, c_in, d, h, w), dtype=jnp.float32)
    # Conv3d weight shape: (out_ch, in_ch, 1, 1, 1)
    weight = jax.random.normal(kw, (c_out, c_in, 1, 1, 1), dtype=jnp.float32) * 0.1
    bias = jax.random.normal(kb, (c_out,), dtype=jnp.float32) * 0.1

    out = outconv_forward(x, weight, bias)
    out = jax.block_until_ready(out)

    # Reference check (pure JAX einsum, same math as PyTorch 1x1x1 conv)
    ref = jnp.einsum("ncdhw,oc->nodhw", x, weight.reshape(c_out, c_in)) \
        + bias.reshape(1, c_out, 1, 1, 1)
    assert out.shape == (n, c_out, d, h, w)
    assert jnp.allclose(out, ref, atol=1e-5, rtol=1e-5)

    print("KERNEL_OK")
</pallas_src>

<mosaic_0001>
module attributes {stable_mosaic.version = 11 : i64} {
  func.func @_outconv_kernel(%arg0: i32, %arg1: i32, %arg2: memref<1x4x128xf32, #tpu.memory_space<vmem>>, %arg3: memref<3x4xf32, #tpu.memory_space<vmem>>, %arg4: memref<3x1xf32, #tpu.memory_space<vmem>>, %arg5: memref<1x3x128xf32, #tpu.memory_space<vmem>>) attributes {dimension_semantics = [#tpu.dimension_semantics<parallel>, #tpu.dimension_semantics<parallel>], iteration_bounds = array<i64: 2, 4>, scalar_prefetch = 0 : i64, scratch_operands = 0 : i64, tpu.core_type = #tpu.core_type<tc>, window_params = [{transform_indices = @transform_0, window_bounds = array<i64: 1, 4, 128>}, {pipeline_mode = #tpu.pipeline_mode<synchronous>, transform_indices = @transform_1, window_bounds = array<i64: 3, 4>}, {pipeline_mode = #tpu.pipeline_mode<synchronous>, transform_indices = @transform_2, window_bounds = array<i64: 3, 1>}, {transform_indices = @transform_3, window_bounds = array<i64: 1, 3, 128>}]} {
    %c0 = arith.constant 0 : index
    %c0_0 = arith.constant 0 : index
    %c0_1 = arith.constant 0 : index
    %0 = vector.load %arg2[%c0, %c0_0, %c0_1] : memref<1x4x128xf32, #tpu.memory_space<vmem>>, vector<1x4x128xf32>
    %1 = vector.shape_cast %0 : vector<1x4x128xf32> to vector<4x128xf32>
    %c0_2 = arith.constant 0 : index
    %c0_3 = arith.constant 0 : index
    %2 = vector.load %arg3[%c0_2, %c0_3] : memref<3x4xf32, #tpu.memory_space<vmem>>, vector<3x4xf32>
    %c0_4 = arith.constant 0 : index
    %c0_5 = arith.constant 0 : index
    %3 = vector.load %arg4[%c0_4, %c0_5] : memref<3x1xf32, #tpu.memory_space<vmem>>, vector<3x1xf32>
    %4 = vector.shape_cast %3 : vector<3x1xf32> to vector<3x1xf32>
    %5 = vector.broadcast %4 : vector<3x1xf32> to vector<3x128xf32>
    %6 = vector.extract_strided_slice %2 {offsets = [0, 0], sizes = [3, 1], strides = [1, 1]} : vector<3x4xf32> to vector<3x1xf32>
    %7 = vector.extract_strided_slice %1 {offsets = [0, 0], sizes = [1, 128], strides = [1, 1]} : vector<4x128xf32> to vector<1x128xf32>
    %8 = vector.broadcast %6 : vector<3x1xf32> to vector<3x128xf32>
    %9 = vector.broadcast %7 : vector<1x128xf32> to vector<3x128xf32>
    %10 = arith.mulf %8, %9 : vector<3x128xf32>
    %11 = arith.addf %5, %10 : vector<3x128xf32>
    %12 = vector.extract_strided_slice %2 {offsets = [0, 1], sizes = [3, 1], strides = [1, 1]} : vector<3x4xf32> to vector<3x1xf32>
    %13 = vector.extract_strided_slice %1 {offsets = [1, 0], sizes = [1, 128], strides = [1, 1]} : vector<4x128xf32> to vector<1x128xf32>
    %14 = vector.broadcast %12 : vector<3x1xf32> to vector<3x128xf32>
    %15 = vector.broadcast %13 : vector<1x128xf32> to vector<3x128xf32>
    %16 = arith.mulf %14, %15 : vector<3x128xf32>
    %17 = arith.addf %11, %16 : vector<3x128xf32>
    %18 = vector.extract_strided_slice %2 {offsets = [0, 2], sizes = [3, 1], strides = [1, 1]} : vector<3x4xf32> to vector<3x1xf32>
    %19 = vector.extract_strided_slice %1 {offsets = [2, 0], sizes = [1, 128], strides = [1, 1]} : vector<4x128xf32> to vector<1x128xf32>
    %20 = vector.broadcast %18 : vector<3x1xf32> to vector<3x128xf32>
    %21 = vector.broadcast %19 : vector<1x128xf32> to vector<3x128xf32>
    %22 = arith.mulf %20, %21 : vector<3x128xf32>
    %23 = arith.addf %17, %22 : vector<3x128xf32>
    %24 = vector.extract_strided_slice %2 {offsets = [0, 3], sizes = [3, 1], strides = [1, 1]} : vector<3x4xf32> to vector<3x1xf32>
    %25 = vector.extract_strided_slice %1 {offsets = [3, 0], sizes = [1, 128], strides = [1, 1]} : vector<4x128xf32> to vector<1x128xf32>
    %26 = vector.broadcast %24 : vector<3x1xf32> to vector<3x128xf32>
    %27 = vector.broadcast %25 : vector<1x128xf32> to vector<3x128xf32>
    %28 = arith.mulf %26, %27 : vector<3x128xf32>
    %29 = arith.addf %23, %28 : vector<3x128xf32>
    %c0_6 = arith.constant 0 : index
    %c0_7 = arith.constant 0 : index
    %c0_8 = arith.constant 0 : index
    %30 = vector.load %arg5[%c0_6, %c0_7, %c0_8] : memref<1x3x128xf32, #tpu.memory_space<vmem>>, vector<1x3x128xf32>
    %31 = vector.shape_cast %30 : vector<1x3x128xf32> to vector<3x128xf32>
    %32 = vector.shape_cast %29 : vector<3x128xf32> to vector<1x3x128xf32>
    tpu.vector_store %arg5[%c0_6, %c0_7, %c0_8], %32 {strides = array<i32>} : memref<1x3x128xf32, #tpu.memory_space<vmem>>, vector<1x3x128xf32>,
    return
  }
  func.func @transform_0(%arg0: i32, %arg1: i32) -> (i32, i32, i32) {
    %c0_i32 = arith.constant 0 : i32
    %c0_i32_0 = arith.constant 0 : i32
    return %arg0, %c0_i32, %arg1 : i32, i32, i32
  }
  func.func @transform_1(%arg0: i32, %arg1: i32) -> (i32, i32) {
    %c0_i32 = arith.constant 0 : i32
    %c0_i32_0 = arith.constant 0 : i32
    %c0_i32_1 = arith.constant 0 : i32
    return %c0_i32, %c0_i32_0 : i32, i32
  }
  func.func @transform_2(%arg0: i32, %arg1: i32) -> (i32, i32) {
    %c0_i32 = arith.constant 0 : i32
    %c0_i32_0 = arith.constant 0 : i32
    %c0_i32_1 = arith.constant 0 : i32
    return %c0_i32, %c0_i32_0 : i32, i32
  }
  func.func @transform_3(%arg0: i32, %arg1: i32) -> (i32, i32, i32) {
    %c0_i32 = arith.constant 0 : i32
    %c0_i32_0 = arith.constant 0 : i32
    return %arg0, %c0_i32, %arg1 : i32, i32, i32
  }
}

</mosaic_0001>

<bundles_post_ra>
// kernel: tpu_custom_call.1
= control target key start
LH: loop header
LB: loop body
LE: loop exit
PB: predicated region body
PF: predicated region fallthrough
CT: control target
= control target key end

     0   :  { %8 = vsyncpa [#allocation3], 0  ;;  %s729_s0 = inlined_call_operand.hbm [shape: f32[2,4,512], index: 0, kind: input, shape index: {}]   ;;  %s730_s1 = inlined_call_operand.vmem [shape: f32[3,4], index: 1, kind: input, shape index: {}]   ;;  %s731_s2 = inlined_call_operand.vmem [shape: f32[3,1], index: 2, kind: input, shape index: {}]   ;;  %s732_s3 = inlined_call_operand.vmem [shape: f32[2,3,512], index: 3, kind: output, shape index: {}]  }
   0x1   :  { %10 = vsyncpa [#allocation3 + $0x1], 0  ;;  %s571_s12 = smov 0   ;;  %s573_s13 = smov 0  }
   0x2   :  { %s575_s14 = smov 0   ;;  %s577_s15 = smov 0  }
   0x3   :  { %s579_s16 = smov 0   ;;  %s581_s17 = smov 0  }
   0x4   :  { %s583_s18 = smov 0   ;;  %s585_s19 = smov 0  }
   0x5 LB: > { %s356_s20 = sadd.s32 4294967295, %s544_s19   ;;  %s25_s21 = sadd.s32 1, %s536_s17  ;;  %s544_s19 = sphi %s585_s19, %s16_s19   ;;  %s540_s18 = sphi %s583_s18, %s744_s18   ;;  %s536_s17 = sphi %s581_s17, %s743_s17   ;;  %s532_s16 = sphi %s579_s16, %s742_s16   ;;  %s528_s15 = sphi %s577_s15, %s741_s15   ;;  %s524_s14 = sphi %s575_s14, %s740_s14   ;;  %s520_s13 = sphi %s573_s13, %s739_s13   ;;  %s516_s12 = sphi %s571_s12, %s738_s12  }
   0x6   : > { %p26_p0 = scmp.ge.s32.totalorder %s25_s21, 4  ;;  %s28_s22 = sadd.s32 1, %s540_s18 }
   0x7   : > { %s37_s23 = sadd.s32 1, %s524_s14  ;;  %p44_p1 = scmp.ne.s32.totalorder %s524_s14, %s520_s13 }
   0x8   : > { %s746_s21 = smov (%p26_p0, %s25_s21), 0  ;;  %s748_s22 = smov (!%p26_p0, %s28_s22), %s540_s18 }
   0x9   : > { %s33_s24 = ssub.s32 %s536_s17, %s746_s21  ;;  %p45_p2 = scmp.eq.s32.totalorder %s544_s19, 0 }
   0xa   : > { %p30_p3 = scmp.ge.s32.totalorder %s748_s22, 2  ;;  %p50_p4 = scmp.ne.s32.totalorder %s520_s13, %s516_s12 }
   0xb   : > { %p622_p5 = por %p45_p2, %p44_p1  ;;  %p51_p6 = scmp.eq.s32.totalorder %s356_s20, 0 }
   0xc   : > { %s750_s22 = smov (%p30_p3, %s748_s22), 0  ;;  %p375_p8 = scmp.lt.s32.totalorder %s544_s19, 8 }
   0xd   : > { %p628_p7 = por %p51_p6, %p50_p4  ;;  %s32_s27 = ssub.s32 %s540_s18, %s750_s22 }
   0xe   : > { %s34_s28 = sor.u32 %s33_s24, %s32_s27  ;;  %s150_s29 = sand.u32 1, %s524_s14  }
   0xf   : > { %p35_p9 = scmp.eq.s32.totalorder %s34_s28, 0  ;;  %s360_s30 = sshll.u32 %s150_s29, 2 }
  0x10   : > { %s361_s4 = sshll.u32 %s540_s18, 2  ;;  %s154_s8 = scalar_lea.vmem [#allocation2], %s360_s30 }
  0x11   : > { %s638_s5 = scalar_select %p35_p9, %s524_s14, %s37_s23  }
  0x12   : > { %s159_s6 = sadd.s32 %s536_s17, %s361_s4  ;;  %s163_s9 = sshll.u32 %s154_s8, 4  ;;  %s646_s9 = int_to_ptr.vmem [resolvable:$true] %s163_s9 }
  0x13   : > { %s362_s7 = sshll.u32 %s159_s6, 6  ;;  %p652_p10 = pnand %p375_p8, %p622_p5 }
  0x14   : > { %s644_s12 = scalar_lea.hbm %s729_s0, %s362_s7  ;;  %s151_s23 = scalar_lea.sflag [#allocation3], %s150_s29 }
  0x15   : > { %s448_s24 = scalar_lea.hbm %s644_s12, 64  ;;  %p450_p0 = pneg %p652_p10 }
  0x16   : > { %p449_p13 = scmp.ne.s32.totalorder %s644_s12, %s448_s24  ;;  %s453_s28 = scalar_lea.hbm %s729_s0, 512 }
  0x17   : > { %p454_p3 = scmp.lt.u32.totalorder %s644_s12, %s729_s0  ;;  %p455_p4 = scmp.lt.u32.totalorder %s453_s28, %s448_s24 }
  0x18   : > { %p451_p1 = pnand %p450_p0, %p449_p13  ;;  %p457_p6 = scmp.lt.u32.totalorder %s448_s24, %s644_s12 }
  0x19   : > { %p456_p5 = por %p455_p4, %p454_p3 }
  0x1a   : > { %p452_p2 = pneg %p451_p1 }
  0x1b   : > { %p458_p8 = por %p457_p6, %p456_p5 }
  0x1d   : > { %p459_p9 = pnand %p458_p8, %p452_p2 }
  0x1f   : > { %462 = shalt.err (!%p459_p9)
}
  0x20   : > { %s463_s29 = scalar_lea.vmem %s646_s9, 64  ;;  %s546_s6 = smov [#allocation2]  }
  0x21   : > { %p464_p13 = scmp.ne.s32.totalorder %s646_s9, %s463_s29  ;;  %s468_s7 = sshll.u32 %s546_s6, 4  ;;  %s469_s7 = int_to_ptr.vmem [resolvable:$false] %s468_s7 }
  0x22   : > { %s470_s8 = scalar_lea.vmem %s469_s7, 128  ;;  %p471_p12 = scmp.lt.s32.totalorder %s646_s9, %s469_s7 }
  0x23   : > { %p466_p1 = pnand %p464_p13, %p450_p0  ;;  %p472_p3 = scmp.lt.s32.totalorder %s470_s8, %s463_s29 }
  0x25   : > { %p467_p11 = pneg %p466_p1  ;;  %p473_p4 = por %p472_p3, %p471_p12 }
  0x27   : > { %p474_p5 = pnand %p473_p4, %p467_p11 }
  0x29   : > { %477 = shalt.err (!%p474_p5)
}
  0x2a   : > { %374 = dma.hbm_to_vmem [thread:$0]  (!%p652_p10), %s644_s12, 64, %s646_s9, %s151_s23  }
  0x2b   : > { %p736_p2 = scmp.lt.s32.totalorder %s544_s19, 9  ;;  %p737_p6 = scmp.ge.s32.totalorder %s544_s19, 1 }
  0x2d   : > { %p169_p0 = pnand %p737_p6, %p736_p2 }
  0x2e   : > { %s174_s10 = sand.u32 (!%p169_p0), 1, %s520_s13  }
  0x2f   : > { %172 = sbr.rel (%p169_p0) target bundleno = 199 (0xc7), region = 32  ;;  %s364_s11 = sshll.u32 (!%p169_p0), %s174_s10, 2 }
  0x30   : > { %s175_s24 = scalar_lea.sflag (!%p169_p0), [#allocation3], %s174_s10  ;;  %s178_s27 = scalar_lea.vmem (!%p169_p0), [#allocation2], %s364_s11 }
  0x36   : > { %511 = dma.done.wait (%p628_p7), %s175_s24, 64  }
  0x37   : > { %513 = vsyncadd (%p628_p7), %s175_s24, 4294967232  ;;  %v547_v0 = vmov 0   ;;  %v548_v1 = vmov 1   ;;  %v213_v2 = vld [vmem:[%s730_s1] sm:$0x7]  ;;  %v549_v4 = vmov 2   ;;  %v225_v6 = vlaneseq }
  0x38   : > { %444 = vset.pattern.permute.xlu0 %v547_v0  ;;  %445 = vset.pattern.permute.xlu1 %v548_v1  ;;  %v214_v3 = vld [vmem:[%s731_s2] sm:$0x7]  ;;  %v550_v5 = vmov 3   ;;  %p204_p7 = scmp.lt.s32.totalorder %s532_s16, 1  ;;  %p206_p10 = scmp.lt.s32.totalorder %s528_s15, 3 }
  0x39   : > { %222 = vperm.xlu0 %444, %v213_v2   ;;  %232 = vperm.xlu1 %445, %v213_v2   ;;  %v226_v7 = vshrl.u32 %v225_v6, 7  ;;  %v212_v9 = vld [vmem:[%s178_s27] sm:$0xf] }
  0x3a   : > { %s752_s16 = smov (!%p204_p7, %s532_s16), 1  ;;  %s754_s15 = smov (!%p206_p10, %s528_s15), 3 }
  0x3b   : > { %v227_v8 = vsub.s32 0, %v226_v7  ;;  %v237_v10 = vsub.s32 1, %v226_v7  ;;  %v247_v11 = vsub.s32 2, %v226_v7  ;;  %s365_s26 = sshll.u32 %s752_s16, 2  ;;  %v257_v17 = vsub.s32 3, %v226_v7 }
  0x3c   : > { %s209_s25 = sadd.s32 %s365_s26, %s754_s15 }
  0x3d   : > { %217 = vperm.xlu0 %444, %v214_v3   ;;  %446 = vset.pattern.permute.xlu1 %v549_v4  ;;  %v228_v12 = vrot.slane %v212_v9, %v227_v8  ;;  %v238_v15 = vrot.slane %v212_v9, %v237_v10  ;;  %v248_v16 = vrot.slane %v212_v9, %v247_v11  ;;  %s366_s28 = sshll.u32 %s209_s25, 2 }
  0x3e   : > { %242 = vperm.xlu1 %446, %v213_v2   ;;  %v258_v24 = vrot.slane %v212_v9, %v257_v17  ;;  %s211_s29 = scalar_lea.vmem %s732_s3, %s366_s28 }
  0x41   : > { %447 = vset.pattern.permute.xlu0 %v550_v5 }
  0x42   : > { %252 = vperm.xlu0 %447, %v213_v2  }
  0xb8   : > { %v223_v13 = vpop.permute.xlu0 %222  ;;  %v233_v14 = vpop.permute.xlu1 %232 }
  0xb9   : > { %v229_v18 = vmul.f32 %v228_v12, %v223_v13  ;;  %v239_v20 = vmul.f32 %v238_v15, %v233_v14 }
  0xbc   : > { %v218_v19 = vpop.permute.xlu0 %217 }
  0xbd   : > { %v230_v21 = vadd.f32 %v229_v18, %v218_v19  ;;  %v243_v22 = vpop.permute.xlu1 %242 }
  0xbe   : > { %v249_v23 = vmul.f32 %v248_v16, %v243_v22 }
  0xbf   : > { %v240_v25 = vadd.f32 %v239_v20, %v230_v21 }
  0xc1   : > { %v250_v26 = vadd.f32 %v249_v23, %v240_v25  ;;  %v253_v27 = vpop.permute.xlu0 %252 }
  0xc2   : > { %v259_v28 = vmul.f32 %v258_v24, %v253_v27 }
  0xc4   : > { %v260_v29 = vadd.f32 %v259_v28, %v250_v26 }
  0xc6   : > { %261 = vst [vmem:[%s211_s29] sm:$0x7] %v260_v29 }
  0xc7 PF: > { %s16_s19 = sadd.s32 1, %s544_s19   ;;  %s738_s12 = smov %s520_s13 }
  0xc8   : > { %p13_p11 = scmp.ge.s32.totalorder %s16_s19, 10   ;;  %s739_s13 = smov %s524_s14 }
  0xc9   : > { %s740_s14 = smov %s638_s5  ;;  %s741_s15 = smov %s536_s17 }
  0xca   : > { %s742_s16 = smov %s540_s18  ;;  %s743_s17 = smov %s746_s21 }
  0xcb   : > { %s744_s18 = smov %s750_s22  ;;  %15 = sbr.rel (!%p13_p11) target bundleno = 5 (0x5), region = 72 }
  0xd2   :  { %289 = vsyncpa [#allocation3], 1 }
  0xd3   :  { %291 = vsyncpa [#allocation3 + $0x1], 1 }

</bundles_post_ra>
